<compile_context>
chip_gen: v6e
topology: v6e:2x2x1
jax: 0.10.0
libtpu: 0.0.40
codegen_flags: <defaults>
</compile_context>

<pallas_src>
import functools

import numpy as np
import jax
import jax.numpy as jnp
from jax import lax
from jax.experimental import pallas as pl
from jax.experimental.pallas import tpu as pltpu

LANE = 128


def _round_up(n, m):
    return ((n + m - 1) // m) * m


def _pick_tile(total, max_tile, unit):
    """Largest multiple of `unit` that divides `total` and is <= max_tile."""
    t = min(total, max_tile)
    t -= t % unit
    t = max(t, unit)
    while total % t:
        t -= unit
    return t


def _vmem_capacity_bytes():
    try:
        return int(pltpu.get_tpu_info().vmem_capacity_bytes)
    except Exception:
        return 64 << 20  # conservative fallback (v7x-sized)


_VMEM_CAP = _vmem_capacity_bytes()
# ~48 MiB on v7x (64 MiB physical), ~96 MiB on v5e/v6e (128 MiB physical).
_VMEM_LIMIT = min(int(_VMEM_CAP * 3 // 4), 96 << 20)
# Bigger M tiles where VMEM is plentiful (v5e/v6e), tighter on v7x.
_TM_MAX = 1024 if _VMEM_CAP >= (128 << 20) else 512


# ----------------------------- Pallas kernels -----------------------------

def _conv_gemm_kernel(p_ref, w_ref, s_ref, b_ref, o_ref, acc_ref, *, leaky):
    """K-tiled im2col GEMM tile with fused affine (+LeakyReLU) epilogue.

    p_ref: (TM, TK) bf16 patches tile
    w_ref: (TK, TN) bf16 weight tile
    s_ref, b_ref: (1, TN) f32 per-channel scale / shift
    o_ref: (TM, TN) bf16 output tile (written only on the last K step)
    acc_ref: (TM, TN) f32 accumulator scratch (resident across the K axis)
    """
    k = pl.program_id(2)

    @pl.when(k == 0)
    def _():
        acc_ref[...] = jnp.zeros_like(acc_ref)

    acc_ref[...] += jnp.dot(p_ref[...], w_ref[...],
                            preferred_element_type=jnp.float32)

    @pl.when(k == pl.num_programs(2) - 1)
    def _():
        y = acc_ref[...] * s_ref[...] + b_ref[...]
        if leaky:
            y = jnp.maximum(y, 0.1 * y)           # LeakyReLU without cmp+select
        o_ref[...] = y.astype(o_ref.dtype)


def _yolo_kernel(p_ref, exp_ref, xsel_ref, ysel_ref, mul_ref, o_ref, *, tm, gsize):
    """predict_transform elementwise hot path on a (TM, F_pad) tile.

    Rows are flattened (b, h, w); grid offsets come from an in-kernel iota.
    Per-column constants (1, F_pad):
      exp_ref  : 1.0 on w/h columns (exp), else sigmoid
      xsel/ysel: 1.0 on the x / y columns (which grid offset to add)
      mul_ref  : stride on x/y, anchor_w/h on w/h, 1 elsewhere
    One transcendental per element: exp(p) for w/h, sigmoid(p) = 1/(1+exp(-p))
    elsewhere via a single exp + approx EUP reciprocal.
    """
    i = pl.program_id(0)
    p = p_ref[...].astype(jnp.float32)
    emask = exp_ref[...] > 0.5
    q = jnp.where(emask, p, -p)
    e = jnp.exp(q)
    t = jnp.where(emask, e, pl.reciprocal(1.0 + e, approx=True))
    rows = lax.broadcasted_iota(jnp.int32, (tm, 1), 0) + i * tm
    gg = rows % (gsize * gsize)                   # spatial index h*G + w
    cx = (gg % gsize).astype(jnp.float32)
    cy = (gg // gsize).astype(jnp.float32)
    add = cx * xsel_ref[...] + cy * ysel_ref[...]
    o_ref[...] = (t + add) * mul_ref[...]


# ------------------------------ JAX wrappers ------------------------------

def _im2col_nhwc(x, k, s, p):
    """im2col on an NHWC activation, built directly in bf16 (halves the HBM
    footprint of the expanded tensor).  Columns ordered (kh, kw, c).
    TODO(synk): fold this window expansion into the conv kernel itself."""
    B, H, W, C = x.shape
    xp = jnp.pad(x.astype(jnp.bfloat16), ((0, 0), (p, p), (p, p), (0, 0)))
    Ho = (H + 2 * p - k) // s + 1
    Wo = (W + 2 * p - k) // s + 1
    cols = []
    for dh in range(k):
        for dw in range(k):
            cols.append(xp[:, dh:dh + s * Ho:s, dw:dw + s * Wo:s, :])
    patches = jnp.concatenate(cols, axis=-1).reshape(B * Ho * Wo, k * k * C)
    return patches, Ho, Wo


def _conv_gemm(patches, wm, scale, shift, *, leaky):
    """Tiled (M x K) @ (K x F) GEMM with fused per-channel affine epilogue.
    Returns (M, F) bf16."""
    M, K = patches.shape
    F_ = wm.shape[1]
    K_pad = _round_up(K, LANE)
    F_pad = _round_up(F_, LANE)
    TM = min(_TM_MAX, _round_up(M, 8))
    M_pad = _round_up(M, TM)
    TN = _pick_tile(F_pad, 256, LANE)             # 256-wide MXU tiles when possible
    TK = _pick_tile(K_pad, 512, LANE)

    p_pad = jnp.pad(patches, ((0, M_pad - M), (0, K_pad - K)))
    w_pad = jnp.pad(wm.astype(jnp.bfloat16), ((0, K_pad - K), (0, F_pad - F_)))
    s_pad = jnp.pad(scale.reshape(1, F_).astype(jnp.float32),
                    ((0, 0), (0, F_pad - F_)))
    b_pad = jnp.pad(shift.reshape(1, F_).astype(jnp.float32),
                    ((0, 0), (0, F_pad - F_)))

    grid = (M_pad // TM, F_pad // TN, K_pad // TK)   # reduction axis last
    out = pl.pallas_call(
        functools.partial(_conv_gemm_kernel, leaky=leaky),
        out_shape=jax.ShapeDtypeStruct((M_pad, F_pad), jnp.bfloat16),
        grid_spec=pltpu.PrefetchScalarGridSpec(
            num_scalar_prefetch=0,
            grid=grid,
            in_specs=[
                pl.BlockSpec((TM, TK), lambda i, j, k: (i, k)),   # patches
                pl.BlockSpec((TK, TN), lambda i, j, k: (k, j)),   # weights
                pl.BlockSpec((1, TN), lambda i, j, k: (0, j)),    # scale
                pl.BlockSpec((1, TN), lambda i, j, k: (0, j)),    # shift
            ],
            out_specs=pl.BlockSpec((TM, TN), lambda i, j, k: (i, j)),
            scratch_shapes=[pltpu.VMEM((TM, TN), jnp.float32)],
        ),
        compiler_params=pltpu.CompilerParams(
            dimension_semantics=("parallel", "parallel", "arbitrary"),
            vmem_limit_bytes=_VMEM_LIMIT),
    )(p_pad, w_pad, s_pad, b_pad)
    return out[:M, :F_]


def conv_block(x, w, gamma, beta_or_bias, *, stride, pad, use_bn, leaky, eps=1e-5):
    """Conv2d (+ training-mode BatchNorm) (+ LeakyReLU) on an NHWC input (bf16)."""
    F_, C, k, _ = w.shape
    B = x.shape[0]
    patches, Ho, Wo = _im2col_nhwc(x, k, stride, pad)            # (M, K) bf16
    K = patches.shape[1]
    # weight (F, C, kH, kW) -> (kH, kW, C, F) matches the patch column order
    wm = jnp.transpose(w, (2, 3, 1, 0)).reshape(K, F_)

    if use_bn:
        # Raw (affine-deferred) GEMM, then a cheap O(M*F) batch-stat reduction
        # of the actual bf16 conv output (exact training-mode BN semantics;
        # padded rows excluded since we sliced to :M), then XLA-fused affine
        # + LeakyReLU.  This replaces the O(M*K^2) covariance-based stats.
        z = _conv_gemm(patches, wm,
                       jnp.ones((F_,), jnp.float32),
                       jnp.zeros((F_,), jnp.float32), leaky=False)
        zf = z.astype(jnp.float32)
        mean = jnp.mean(zf, axis=0)
        var = jnp.maximum(jnp.mean(zf * zf, axis=0) - mean * mean, 0.0)
        scale = gamma * lax.rsqrt(var + eps)
        shift = beta_or_bias - mean * scale
        y = zf * scale[None, :] + shift[None, :]
        if leaky:
            y = jnp.maximum(y, 0.1 * y)
        out = y.astype(jnp.bfloat16)
    else:
        # Bias (+ activation) fused into the GEMM epilogue.
        out = _conv_gemm(patches, wm,
                         jnp.ones((F_,), jnp.float32),
                         beta_or_bias.astype(jnp.float32), leaky=leaky)

    return out.reshape(B, Ho, Wo, F_)                            # NHWC bf16


def upsample_nearest2x(x):
    # nn.Upsample(scale_factor=2, mode='nearest') on NHWC — pure data movement.
    return jnp.repeat(jnp.repeat(x, 2, axis=1), 2, axis=2)


def predict_transform(x_nhwc, inp_dim, anchors, num_classes):
    """YOLO detection-head transform on the NHWC conv output (B, G, G, A*bbox)."""
    B, G, _, Fc = x_nhwc.shape
    stride = inp_dim // G
    bbox = 5 + num_classes
    A = len(anchors)
    assert Fc == A * bbox

    pred = x_nhwc.reshape(B * G * G, Fc)
    M = pred.shape[0]
    F_pad = _round_up(Fc, LANE)
    TM = min(_TM_MAX, _round_up(M, 8))
    M_pad = _round_up(M, TM)

    j = np.arange(Fc) % bbox
    exp_mask = ((j == 2) | (j == 3)).astype(np.float32)          # w/h -> exp
    xsel = (j == 0).astype(np.float32)                           # x -> +cx
    ysel = (j == 1).astype(np.float32)                           # y -> +cy
    mul = np.ones((Fc,), np.float32)
    mul[(j == 0) | (j == 1)] = float(stride)                     # (sigmoid+off)*stride
    for a, (aw, ah) in enumerate(anchors):                       # exp * anchor (px)
        mul[a * bbox + 2] = float(aw)
        mul[a * bbox + 3] = float(ah)

    def pad_row(v):
        out = np.zeros((1, F_pad), np.float32)
        out[0, :Fc] = v
        return jnp.asarray(out)

    p_pad = jnp.pad(pred, ((0, M_pad - M), (0, F_pad - Fc)))
    out = pl.pallas_call(
        functools.partial(_yolo_kernel, tm=TM, gsize=G),
        out_shape=jax.ShapeDtypeStruct((M_pad, F_pad), jnp.float32),
        grid_spec=pltpu.PrefetchScalarGridSpec(
            num_scalar_prefetch=0,
            grid=(M_pad // TM,),
            in_specs=[pl.BlockSpec((TM, F_pad), lambda i: (i, 0)),
                      pl.BlockSpec((1, F_pad), lambda i: (0, 0)),
                      pl.BlockSpec((1, F_pad), lambda i: (0, 0)),
                      pl.BlockSpec((1, F_pad), lambda i: (0, 0)),
                      pl.BlockSpec((1, F_pad), lambda i: (0, 0))],
            out_specs=pl.BlockSpec((TM, F_pad), lambda i: (i, 0)),
        ),
        compiler_params=pltpu.CompilerParams(
            dimension_semantics=("parallel",),
            vmem_limit_bytes=_VMEM_LIMIT),
    )(p_pad, pad_row(exp_mask), pad_row(xsel), pad_row(ysel), pad_row(mul))

    # (B*G*G, A*bbox) -> (B, G*G*A, bbox): identical to the torch view/transpose chain.
    return out[:M, :Fc].reshape(B, G * G * A, bbox)


# ----------------------- Darknet config / params / fwd ---------------------

# Equivalent of parse_cfg() output for a tiny YOLOv3-style network
# (16x16 input, 3 classes, 3 anchors per head -> 3*(5+3)=24 detection filters).
BLOCKS = [
    {'type': 'net', 'height': '16', 'width': '16', 'channels': '3'},
    {'type': 'convolutional', 'batch_normalize': '1', 'filters': '8',  'size': '3', 'stride': '1', 'pad': '1', 'activation': 'leaky'},
    {'type': 'convolutional', 'batch_normalize': '1', 'filters': '16', 'size': '3', 'stride': '2', 'pad': '1', 'activation': 'leaky'},
    {'type': 'convolutional', 'batch_normalize': '1', 'filters': '16', 'size': '1', 'stride': '1', 'pad': '1', 'activation': 'leaky'},
    {'type': 'shortcut', 'from': '-2', 'activation': 'linear'},
    {'type': 'convolutional', 'batch_normalize': '1', 'filters': '32', 'size': '3', 'stride': '2', 'pad': '1', 'activation': 'leaky'},
    {'type': 'convolutional', 'filters': '24', 'size': '1', 'stride': '1', 'pad': '1', 'activation': 'linear'},
    {'type': 'yolo', 'mask': '3,4,5', 'anchors': '10,14,23,27,37,58,81,82,135,169,344,319', 'classes': '3', 'num': '6'},
    {'type': 'route', 'layers': '-3'},
    {'type': 'convolutional', 'batch_normalize': '1', 'filters': '16', 'size': '1', 'stride': '1', 'pad': '1', 'activation': 'leaky'},
    {'type': 'upsample', 'stride': '2'},
    {'type': 'route', 'layers': '-1, 3'},
    {'type': 'convolutional', 'filters': '24', 'size': '1', 'stride': '1', 'pad': '1', 'activation': 'linear'},
    {'type': 'yolo', 'mask': '0,1,2', 'anchors': '10,14,23,27,37,58,81,82,135,169,344,319', 'classes': '3', 'num': '6'},
]


def build_params(blocks, key):
    """Mirrors create_modules()' filter bookkeeping; deterministic init."""
    params = []
    prev_filters = int(blocks[0]['channels'])
    output_filters = []
    for index, blk in enumerate(blocks[1:]):
        p = None
        if blk['type'] == 'convolutional':
            use_bn = int(blk.get('batch_normalize', 0)) == 1
            filters = int(blk['filters'])
            k = int(blk['size'])
            key, kw, ka, kb = jax.random.split(key, 4)
            w = 0.1 * jax.random.normal(kw, (filters, prev_filters, k, k), jnp.float32)
            if use_bn:
                a = 1.0 + 0.1 * jax.random.normal(ka, (filters,), jnp.float32)  # gamma
                b = 0.1 * jax.random.normal(kb, (filters,), jnp.float32)        # beta
            else:
                a = jnp.ones((filters,), jnp.float32)                           # unused
                b = 0.1 * jax.random.normal(kb, (filters,), jnp.float32)        # conv bias
            p = {'w': w, 'a': a, 'b': b, 'use_bn': use_bn,
                 'stride': int(blk['stride']),
                 'pad': (k - 1) // 2 if int(blk['pad']) else 0,
                 'leaky': blk['activation'] == 'leaky'}
            prev_filters = filters
        elif blk['type'] == 'route':
            layers = [int(v) for v in blk['layers'].split(',')]
            start = layers[0]
            end = layers[1] if len(layers) > 1 else 0
            if start > 0:
                start -= index
            if end > 0:
                end -= index
            if end < 0:
                prev_filters = output_filters[index + start] + output_filters[index + end]
            else:
                prev_filters = output_filters[index + start]
        elif blk['type'] == 'yolo':
            mask = [int(m) for m in blk['mask'].split(',')]
            anchors = [int(v) for v in blk['anchors'].split(',')]
            anchors = [(anchors[i], anchors[i + 1]) for i in range(0, len(anchors), 2)]
            p = {'anchors': [anchors[m] for m in mask]}
        output_filters.append(prev_filters)
        params.append(p)
    return params


def darknet_forward(blocks, params, x_nchw):
    net_info = blocks[0]
    modules = blocks[1:]
    x = jnp.transpose(x_nchw, (0, 2, 3, 1))        # NCHW -> NHWC once, at the input
    outputs = {}
    detections = None
    for i, blk in enumerate(modules):
        t = blk['type']
        if t == 'convolutional':
            p = params[i]
            x = conv_block(x, p['w'], p['a'], p['b'], stride=p['stride'],
                           pad=p['pad'], use_bn=p['use_bn'], leaky=p['leaky'])
        elif t == 'upsample':
            x = upsample_nearest2x(x)
        elif t == 'route':
            layers = [int(v) for v in blk['layers'].split(',')]
            if layers[0] > 0:
                layers[0] -= i
            if len(layers) == 1:
                x = outputs[i + layers[0]]
            else:
                if layers[1] > 0:
                    layers[1] -= i
                # channel concat on the lane axis (NHWC)
                x = jnp.concatenate([outputs[i + layers[0]],
                                     outputs[i + layers[1]]], axis=-1)
        elif t == 'shortcut':
            # tiny elementwise residual add: plain jnp (a standalone pallas_call
            # here is pure launch + HBM-round-trip overhead).
            frm = int(blk['from'])
            x = outputs[i - 1] + outputs[i + frm]
        elif t == 'yolo':
            anchors = params[i]['anchors']
            inp_dim = int(net_info['height'])
            num_classes = int(blk['classes'])
            x = predict_transform(x, inp_dim, anchors, num_classes)
            detections = x if detections is None else jnp.concatenate([detections, x], axis=1)
        outputs[i] = x
    return detections


if __name__ == "__main__":
    key = jax.random.PRNGKey(0)
    kx, kp = jax.random.split(key)
    params = build_params(BLOCKS, kp)
    x = jax.random.normal(kx, (2, 3, 16, 16), jnp.float32)   # NCHW, like PyTorch
    dets = darknet_forward(BLOCKS, params, x)
    dets = jax.block_until_ready(dets)
    # two YOLO heads: 4x4x3 + 8x8x3 anchors, 5 + 3 class attrs each
    assert dets.shape == (2, 4 * 4 * 3 + 8 * 8 * 3, 8), dets.shape
    assert bool(jnp.all(jnp.isfinite(dets)))
    print("KERNEL_OK")
</pallas_src>

<mosaic_0001>
module attributes {stable_mosaic.version = 11 : i64} {
  func.func @_conv_gemm_kernel(%arg0: i32, %arg1: i32, %arg2: i32, %arg3: memref<512x128xbf16, #tpu.memory_space<vmem>>, %arg4: memref<128x128xbf16, #tpu.memory_space<vmem>>, %arg5: memref<1x128xf32, #tpu.memory_space<vmem>>, %arg6: memref<1x128xf32, #tpu.memory_space<vmem>>, %arg7: memref<512x128xbf16, #tpu.memory_space<vmem>>, %arg8: memref<512x128xf32, #tpu.memory_space<vmem>>) attributes {dimension_semantics = [#tpu.dimension_semantics<parallel>, #tpu.dimension_semantics<parallel>, #tpu.dimension_semantics<arbitrary>], iteration_bounds = array<i64: 1, 1, 1>, scalar_prefetch = 0 : i64, scratch_operands = 1 : i64, tpu.core_type = #tpu.core_type<tc>, window_params = [{transform_indices = @transform_0, window_bounds = array<i64: 512, 128>}, {transform_indices = @transform_1, window_bounds = array<i64: 128, 128>}, {transform_indices = @transform_2, window_bounds = array<i64: 1, 128>}, {transform_indices = @transform_3, window_bounds = array<i64: 1, 128>}, {transform_indices = @transform_4, window_bounds = array<i64: 512, 128>}]} {
    %c0_i32 = arith.constant 0 : i32
    %0 = arith.cmpi eq, %arg2, %c0_i32 : i32
    %1 = arith.extui %0 : i1 to i32
    %c0_i32_0 = arith.constant 0 : i32
    %2 = arith.cmpi ne, %1, %c0_i32_0 : i32
    scf.if %2 {
      %cst_10 = arith.constant 0.000000e+00 : f32
      %12 = vector.broadcast %cst_10 : f32 to vector<512x128xf32>
      %c0_11 = arith.constant 0 : index
      %c0_12 = arith.constant 0 : index
      %13 = vector.load %arg8[%c0_11, %c0_12] : memref<512x128xf32, #tpu.memory_space<vmem>>, vector<512x128xf32>
      tpu.vector_store %arg8[%c0_11, %c0_12], %12 {strides = array<i32>} : memref<512x128xf32, #tpu.memory_space<vmem>>, vector<512x128xf32>,
    } else {
    }
    %c0 = arith.constant 0 : index
    %c0_1 = arith.constant 0 : index
    %3 = vector.load %arg8[%c0, %c0_1] : memref<512x128xf32, #tpu.memory_space<vmem>>, vector<512x128xf32>
    %c0_2 = arith.constant 0 : index
    %c0_3 = arith.constant 0 : index
    %4 = vector.load %arg3[%c0_2, %c0_3] : memref<512x128xbf16, #tpu.memory_space<vmem>>, vector<512x128xbf16>
    %c0_4 = arith.constant 0 : index
    %c0_5 = arith.constant 0 : index
    %5 = vector.load %arg4[%c0_4, %c0_5] : memref<128x128xbf16, #tpu.memory_space<vmem>>, vector<128x128xbf16>
    %cst = arith.constant dense<0.000000e+00> : vector<512x128xf32>
    %6 = tpu.matmul %4, %5, %cst {dimension_numbers = #tpu.dot_dimension_numbers<[1], [0], [0], [1], [0, 0, 1, 1], [], []>} : vector<512x128xbf16>, vector<128x128xbf16>, vector<512x128xf32> -> vector<512x128xf32>
    %7 = arith.addf %3, %6 : vector<512x128xf32>
    %c0_6 = arith.constant 0 : index
    %c0_7 = arith.constant 0 : index
    %8 = vector.load %arg8[%c0_6, %c0_7] : memref<512x128xf32, #tpu.memory_space<vmem>>, vector<512x128xf32>
    tpu.vector_store %arg8[%c0_6, %c0_7], %7 {strides = array<i32>} : memref<512x128xf32, #tpu.memory_space<vmem>>, vector<512x128xf32>,
    %c0_i32_8 = arith.constant 0 : i32
    %9 = arith.cmpi eq, %arg2, %c0_i32_8 : i32
    %10 = arith.extui %9 : i1 to i32
    %c0_i32_9 = arith.constant 0 : i32
    %11 = arith.cmpi ne, %10, %c0_i32_9 : i32
    scf.if %11 {
      %c0_10 = arith.constant 0 : index
      %c0_11 = arith.constant 0 : index
      %12 = vector.load %arg8[%c0_10, %c0_11] : memref<512x128xf32, #tpu.memory_space<vmem>>, vector<512x128xf32>
      %c0_12 = arith.constant 0 : index
      %c0_13 = arith.constant 0 : index
      %13 = vector.load %arg5[%c0_12, %c0_13] : memref<1x128xf32, #tpu.memory_space<vmem>>, vector<1x128xf32>
      %14 = vector.broadcast %13 : vector<1x128xf32> to vector<512x128xf32>
      %15 = arith.mulf %12, %14 : vector<512x128xf32>
      %c0_14 = arith.constant 0 : index
      %c0_15 = arith.constant 0 : index
      %16 = vector.load %arg6[%c0_14, %c0_15] : memref<1x128xf32, #tpu.memory_space<vmem>>, vector<1x128xf32>
      %17 = vector.broadcast %16 : vector<1x128xf32> to vector<512x128xf32>
      %18 = arith.addf %15, %17 : vector<512x128xf32>
      %19 = arith.truncf %18 : vector<512x128xf32> to vector<512x128xbf16>
      %c0_16 = arith.constant 0 : index
      %c0_17 = arith.constant 0 : index
      %20 = vector.load %arg7[%c0_16, %c0_17] : memref<512x128xbf16, #tpu.memory_space<vmem>>, vector<512x128xbf16>
      tpu.vector_store %arg7[%c0_16, %c0_17], %19 {strides = array<i32>} : memref<512x128xbf16, #tpu.memory_space<vmem>>, vector<512x128xbf16>,
    } else {
    }
    return
  }
  func.func @transform_0(%arg0: i32, %arg1: i32, %arg2: i32) -> (i32, i32) {
    %c0_i32 = arith.constant 0 : i32
    return %arg0, %arg2 : i32, i32
  }
  func.func @transform_1(%arg0: i32, %arg1: i32, %arg2: i32) -> (i32, i32) {
    %c0_i32 = arith.constant 0 : i32
    return %arg2, %arg1 : i32, i32
  }
  func.func @transform_2(%arg0: i32, %arg1: i32, %arg2: i32) -> (i32, i32) {
    %c0_i32 = arith.constant 0 : i32
    %c0_i32_0 = arith.constant 0 : i32
    return %c0_i32, %arg1 : i32, i32
  }
  func.func @transform_3(%arg0: i32, %arg1: i32, %arg2: i32) -> (i32, i32) {
    %c0_i32 = arith.constant 0 : i32
    %c0_i32_0 = arith.constant 0 : i32
    return %c0_i32, %arg1 : i32, i32
  }
  func.func @transform_4(%arg0: i32, %arg1: i32, %arg2: i32) -> (i32, i32) {
    %c0_i32 = arith.constant 0 : i32
    return %arg0, %arg1 : i32, i32
  }
}

</mosaic_0001>

<bundles_post_ra>
// kernel: tpu_custom_call.1
= control target key start
LH: loop header
LB: loop body
LE: loop exit
PB: predicated region body
PF: predicated region fallthrough
CT: control target
= control target key end

     0   :  { %9 = vsyncpa [#allocation4], 0  ;;  %s2257_s0 = inlined_call_operand.hbm [shape: bf16[512,128], index: 0, kind: input, shape index: {}]   ;;  %s2258_s1 = inlined_call_operand.hbm [shape: bf16[128,128], index: 1, kind: input, shape index: {}]   ;;  %s2259_s2 = inlined_call_operand.vmem [shape: f32[1,128], index: 2, kind: input, shape index: {}]   ;;  %s2260_s3 = inlined_call_operand.vmem [shape: f32[1,128], index: 3, kind: input, shape index: {}]   ;;  %s2261_s4 = inlined_call_operand.hbm [shape: bf16[512,128], index: 4, kind: output, shape index: {}]  }
   0x1   :  { %10 = vsyncpa [#allocation7], 0 }
   0x2   :  { %11 = vsyncpa [#allocation5], 0  ;;  %s2071_s15 = smov [#allocation3]  }
   0x3   :  { %s17_s16 = sshll.u32 %s2071_s15, 4  ;;  %s18_s16 = int_to_ptr.vmem [resolvable:$true] %s17_s16 }
   0x4   :  { %s2013_s17 = scalar_lea.vmem %s18_s16, 4096  ;;  %p2018_p1 = scmp.lt.s32.totalorder %s18_s16, %s18_s16 }
   0x5   :  { %p2014_p0 = scmp.ne.s32.totalorder %s18_s16, %s2013_s17  ;;  %p2019_p2 = scmp.lt.s32.totalorder %s2013_s17, %s2013_s17 }
   0x7   :  { %p2020_p3 = por %p2019_p2, %p2018_p1 }
   0x9   :  { %p2021_p4 = pnand %p2020_p3, %p2014_p0 }
   0xb   :  { %2024 = shalt.err (!%p2021_p4)
}
   0xc   :  { %s2072_s18 = smov 64   ;;  %s2073_s19 = smov 4  }
   0xd   :  { %23 = dma.hbm_to_vmem [thread:$0]  %s2257_s0, 4096, %s18_s16, [#allocation4], %s2072_s18, %s2072_s18, %s2073_s19  }
   0xe   :  { %s2074_s22 = smov [#allocation6]  }
   0xf   :  { %s29_s23 = sshll.u32 %s2074_s22, 4  ;;  %s30_s23 = int_to_ptr.vmem [resolvable:$true] %s29_s23 }
  0x10   :  { %s2033_s24 = scalar_lea.vmem %s30_s23, 1024  ;;  %p2038_p6 = scmp.lt.s32.totalorder %s30_s23, %s30_s23 }
  0x11   :  { %p2034_p5 = scmp.ne.s32.totalorder %s30_s23, %s2033_s24  ;;  %p2039_p7 = scmp.lt.s32.totalorder %s2033_s24, %s2033_s24 }
  0x13   :  { %p2040_p8 = por %p2039_p7, %p2038_p6 }
  0x15   :  { %p2041_p9 = pnand %p2040_p8, %p2034_p5 }
  0x17   :  { %2044 = shalt.err (!%p2041_p9)
}
  0x18   :  { %35 = dma.hbm_to_vmem [thread:$0]  %s2258_s1, 1024, %s30_s23, [#allocation7], %s2072_s18, %s2072_s18, %s2073_s19  }
  0x19   :  { %2065 = dma.done.wait [#allocation4], 4096  }
  0x1a   :  { %2066 = vsyncadd [#allocation4], 4294963200 }
  0x1b   :  { %2067 = dma.done.wait [#allocation7], 1024  }
  0x1c   :  { %2068 = vsyncadd [#allocation7], 4294966272  ;;  %v1965_v0 = vld [vmem:[#allocation6 + $0x38] sm:$0xff]   ;;  %v1966_v1 = vld [vmem:[#allocation6 + $0x30] sm:$0xff]  }
  0x1d   :  { %1864 = vmatprep.subr.bf16.mxu0 %v1965_v0  ;;  %1944 = vmatprep.subr.bf16.mxu1 %v1965_v0  ;;  %v1967_v2 = vld [vmem:[#allocation6 + $0x28] sm:$0xff]   ;;  %v1968_v3 = vld [vmem:[#allocation6 + $0x20] sm:$0xff]   ;;  %v1969_v6 = vld [vmem:[#allocation6 + $0x18] sm:$0xff]  }
  0x1e   :  { %1865 = vmatpush3.bf16.msra.mxu0 %v1965_v0  ;;  %1952 = vmatpush3.bf16.msra.mxu1 %v1965_v0  ;;  %v1973_v4 = vld [vmem:[#allocation3] sm:$0xff]   ;;  %v1970_v7 = vld [vmem:[#allocation6 + $0x10] sm:$0xff]   ;;  %v1971_v8 = vld [vmem:[#allocation6 + $0x8] sm:$0xff]  }
  0x1f   :  { %1866 = vmatprep.subr.bf16.mxu0 %v1966_v1  ;;  %1945 = vmatprep.subr.bf16.mxu1 %v1966_v1  ;;  %v1974_v5 = vld [vmem:[#allocation3 + $0x80] sm:$0xff]   ;;  %v1975_v10 = vld [vmem:[#allocation3 + $0x8] sm:$0xff]   ;;  %v1977_v12 = vld [vmem:[#allocation3 + $0x10] sm:$0xff]  }
  0x20   :  { %1880 = vmatprep.mubr.bf16.mxu0 %v1973_v4  ;;  %1912 = vmatprep.mubr.bf16.mxu1 %v1974_v5  ;;  %v1972_v9 = vld [vmem:[#allocation6] sm:$0xff]   ;;  %v1976_v11 = vld [vmem:[#allocation3 + $0x88] sm:$0xff]   ;;  %v1978_v13 = vld [vmem:[#allocation3 + $0x90] sm:$0xff]  }
  0x21   :  { %v1979_v14 = vld [vmem:[#allocation3 + $0x18] sm:$0xff]   ;;  %v1981_v16 = vld [vmem:[#allocation3 + $0x20] sm:$0xff]   ;;  %v1983_v18 = vld [vmem:[#allocation3 + $0x28] sm:$0xff]  }
  0x22   :  { %1867 = vmatpush3.bf16.msra.mxu0 %v1966_v1  ;;  %1953 = vmatpush3.bf16.msra.mxu1 %v1966_v1  ;;  %v1980_v15 = vld [vmem:[#allocation3 + $0x98] sm:$0xff]   ;;  %v1982_v17 = vld [vmem:[#allocation3 + $0xa0] sm:$0xff]   ;;  %v1984_v19 = vld [vmem:[#allocation3 + $0xa8] sm:$0xff]  }
  0x23   :  { %1868 = vmatprep.subr.bf16.mxu0 %v1967_v2  ;;  %1946 = vmatprep.subr.bf16.mxu1 %v1967_v2  ;;  %v1985_v20 = vld [vmem:[#allocation3 + $0x30] sm:$0xff]   ;;  %v1987_v22 = vld [vmem:[#allocation3 + $0x38] sm:$0xff]   ;;  %v1989_v24 = vld [vmem:[#allocation3 + $0x40] sm:$0xff]  }
  0x24   :  { %v1986_v21 = vld [vmem:[#allocation3 + $0xb0] sm:$0xff]   ;;  %v1988_v23 = vld [vmem:[#allocation3 + $0xb8] sm:$0xff]   ;;  %v1990_v25 = vld [vmem:[#allocation3 + $0xc0] sm:$0xff]  }
  0x25   :  { %v1991_v26 = vld [vmem:[#allocation3 + $0x48] sm:$0xff]   ;;  %v1993_v28 = vld [vmem:[#allocation3 + $0x50] sm:$0xff]   ;;  %v1995_v30 = vld [vmem:[#allocation3 + $0x58] sm:$0xff]  }
  0x26   :  { %1869 = vmatpush3.bf16.msra.mxu0 %v1967_v2  ;;  %1954 = vmatpush3.bf16.msra.mxu1 %v1967_v2  ;;  %v1992_v27 = vld [vmem:[#allocation3 + $0xc8] sm:$0xff]   ;;  %v1994_v29 = vld [vmem:[#allocation3 + $0xd0] sm:$0xff]   ;;  %v1996_v31 = vld [vmem:[#allocation3 + $0xd8] sm:$0xff]  }
  0x27   :  { %1870 = vmatprep.subr.bf16.mxu0 %v1968_v3  ;;  %1947 = vmatprep.subr.bf16.mxu1 %v1968_v3  ;;  %v1997_v32 = vld [vmem:[#allocation3 + $0x60] sm:$0xff]   ;;  %v1999_v34 = vld [vmem:[#allocation3 + $0x68] sm:$0xff]   ;;  %v2001_v36 = vld [vmem:[#allocation3 + $0x70] sm:$0xff]  }
  0x28   :  { %v1998_v33 = vld [vmem:[#allocation3 + $0xe0] sm:$0xff]   ;;  %v2000_v35 = vld [vmem:[#allocation3 + $0xe8] sm:$0xff]   ;;  %v2002_v37 = vld [vmem:[#allocation3 + $0xf0] sm:$0xff]  }
  0x29   :  { %v2003_v38 = vld [vmem:[#allocation3 + $0x78] sm:$0xff]   ;;  %v2116_v40 = vld [vmem:[%s2259_s2] ss:$0 sm:$0xff]  ;;  %s2075_s2 = smov [#allocation8]  }
  0x2a   :  { %1871 = vmatpush3.bf16.msra.mxu0 %v1968_v3  ;;  %1955 = vmatpush3.bf16.msra.mxu1 %v1968_v3  ;;  %v2004_v39 = vld [vmem:[#allocation3 + $0xf8] sm:$0xff]   ;;  %v2123_v47 = vld [vmem:[%s2260_s3] ss:$0 sm:$0xff]  ;;  %s1450_s3 = sshll.u32 %s2075_s2, 4  ;;  %s1451_s3 = int_to_ptr.vmem [resolvable:$true] %s1450_s3 }
  0x2b   :  { %1872 = vmatprep.subr.bf16.mxu0 %v1969_v6  ;;  %1948 = vmatprep.subr.bf16.mxu1 %v1969_v6  ;;  %s2045_s29 = scalar_lea.vmem %s1451_s3, 4096  ;;  %p2050_p11 = scmp.lt.s32.totalorder %s1451_s3, %s1451_s3 }
  0x2c   :  { %p2046_p10 = scmp.ne.s32.totalorder %s1451_s3, %s2045_s29  ;;  %p2051_p12 = scmp.lt.s32.totalorder %s2045_s29, %s2045_s29 }
  0x2e   :  { %1873 = vmatpush3.bf16.msra.mxu0 %v1969_v6  ;;  %1956 = vmatpush3.bf16.msra.mxu1 %v1969_v6  ;;  %p2052_p13 = por %p2051_p12, %p2050_p11 }
  0x2f   :  { %1874 = vmatprep.subr.bf16.mxu0 %v1970_v7  ;;  %1949 = vmatprep.subr.bf16.mxu1 %v1970_v7 }
  0x30   :  { %p2053_p0 = pnand %p2052_p13, %p2046_p10 }
  0x32   :  { %1875 = vmatpush3.bf16.msra.mxu0 %v1970_v7  ;;  %1957 = vmatpush3.bf16.msra.mxu1 %v1970_v7 }
  0x33   :  { %1876 = vmatprep.subr.bf16.mxu0 %v1971_v8  ;;  %1950 = vmatprep.subr.bf16.mxu1 %v1971_v8 }
  0x36   :  { %1877 = vmatpush3.bf16.msra.mxu0 %v1971_v8  ;;  %1958 = vmatpush3.bf16.msra.mxu1 %v1971_v8 }
  0x37   :  { %1878 = vmatprep.subr.bf16.mxu0 %v1972_v9  ;;  %1951 = vmatprep.subr.bf16.mxu1 %v1972_v9 }
  0x3a   :  { %1879 = vmatpush3.bf16.msra.mxu0 %v1972_v9  ;;  %1959 = vmatpush3.bf16.msra.mxu1 %v1972_v9 }
  0x3d   :  { %1881 = vmatmul.mubr.bf16.vlgmr.msra.gmra.mxu0 %v1975_v10  ;;  %1913 = vmatmul.mubr.bf16.vlgmr.msra.gmra.mxu1 %v1976_v11 }
  0x3e   :  { %1884 = vmatprep.mubr.bf16.mxu0 %v1977_v12  ;;  %1916 = vmatprep.mubr.bf16.mxu1 %v1978_v13 }
  0x45   :  { %1885 = vmatmul.mubr.bf16.gmra.mxu0 %v1979_v14  ;;  %1917 = vmatmul.mubr.bf16.gmra.mxu1 %v1980_v15 }
  0x46   :  { %1888 = vmatprep.mubr.bf16.mxu0 %v1981_v16  ;;  %1920 = vmatprep.mubr.bf16.mxu1 %v1982_v17 }
  0x4d   :  { %1889 = vmatmul.mubr.bf16.gmra.mxu0 %v1983_v18  ;;  %1921 = vmatmul.mubr.bf16.gmra.mxu1 %v1984_v19 }
  0x4e   :  { %1892 = vmatprep.mubr.bf16.mxu0 %v1985_v20  ;;  %1924 = vmatprep.mubr.bf16.mxu1 %v1986_v21 }
  0x55   :  { %1893 = vmatmul.mubr.bf16.gmra.mxu0 %v1987_v22  ;;  %1925 = vmatmul.mubr.bf16.gmra.mxu1 %v1988_v23 }
  0x56   :  { %1896 = vmatprep.mubr.bf16.mxu0 %v1989_v24  ;;  %1928 = vmatprep.mubr.bf16.mxu1 %v1990_v25 }
  0x5d   :  { %1897 = vmatmul.mubr.bf16.gmra.mxu0 %v1991_v26  ;;  %1929 = vmatmul.mubr.bf16.gmra.mxu1 %v1992_v27 }
  0x5e   :  { %1900 = vmatprep.mubr.bf16.mxu0 %v1993_v28  ;;  %1932 = vmatprep.mubr.bf16.mxu1 %v1994_v29 }
  0x65   :  { %1901 = vmatmul.mubr.bf16.gmra.mxu0 %v1995_v30  ;;  %1933 = vmatmul.mubr.bf16.gmra.mxu1 %v1996_v31 }
  0x66   :  { %1904 = vmatprep.mubr.bf16.mxu0 %v1997_v32  ;;  %1936 = vmatprep.mubr.bf16.mxu1 %v1998_v33 }
  0x6d   :  { %1905 = vmatmul.mubr.bf16.gmra.mxu0 %v1999_v34  ;;  %1937 = vmatmul.mubr.bf16.gmra.mxu1 %v2000_v35 }
  0x6e   :  { %1908 = vmatprep.mubr.bf16.mxu0 %v2001_v36  ;;  %1940 = vmatprep.mubr.bf16.mxu1 %v2002_v37 }
  0x75   :  { %1909 = vmatmul.mubr.bf16.gmra.mxu0 %v2003_v38  ;;  %1941 = vmatmul.mubr.bf16.gmra.mxu1 %v2004_v39 }
  0xfd   :  { %v1882_v41 = vpop.f32.mrf.mxu0  ;;  %v1914_v42 = vpop.f32.mrf.mxu1 }
  0xfe   :  { %v992_v43 = vmul.f32 %v1882_v41, %v2116_v40  ;;  %v1024_v44 = vmul.f32 %v1914_v42, %v2116_v40 }
  0xff   :  { %v533_v45 = vpop.f32.mrf.mxu0  ;;  %v661_v46 = vpop.f32.mrf.mxu1 }
 0x100   :  { %v990_v48 = vmul.f32 %v2116_v40, %v533_v45  ;;  %v1022_v49 = vmul.f32 %v2116_v40, %v661_v46  ;;  %v1063_v54 = vadd.f32 %v2123_v47, %v992_v43  ;;  %v1095_v55 = vadd.f32 %v2123_v47, %v1024_v44 }
 0x101   :  { %v1883_v50 = vpop.f32.mrf.mxu0  ;;  %v1915_v51 = vpop.f32.mrf.mxu1 }
 0x102   :  { %v993_v52 = vmul.f32 %v1883_v50, %v2116_v40  ;;  %v1025_v53 = vmul.f32 %v1915_v51, %v2116_v40  ;;  %v1061_v62 = vadd.f32 %v2123_v47, %v990_v48  ;;  %v1093_v63 = vadd.f32 %v2123_v47, %v1022_v49 }
 0x103   :  { %v536_v56 = vpop.f32.mrf.mxu0  ;;  %v664_v57 = vpop.f32.mrf.mxu1 }
 0x104   :  { %v1064_v58 = vadd.f32 %v2123_v47, %v993_v52  ;;  %v1096_v59 = vadd.f32 %v2123_v47, %v1025_v53  ;;  %v991_v60 = vmul.f32 %v2116_v40, %v536_v56  ;;  %v1023_v61 = vmul.f32 %v2116_v40, %v664_v57 }
 0x105   :  { %v1886_v0 = vpop.f32.mrf.mxu0  ;;  %v1918_v1 = vpop.f32.mrf.mxu1 }
 0x106   :  { %v1641_v2 = vpack.c.bf16 %v1064_v58, %v1063_v54  ;;  %v1721_v3 = vpack.c.bf16 %v1096_v59, %v1095_v55  ;;  %v1062_v4 = vadd.f32 %v2123_v47, %v991_v60  ;;  %v1094_v5 = vadd.f32 %v2123_v47, %v1023_v61 }
 0x107   :  { %v996_v6 = vmul.f32 %v1886_v0, %v2116_v40  ;;  %v1028_v7 = vmul.f32 %v1918_v1, %v2116_v40  ;;  %v549_v8 = vpop.f32.mrf.mxu0  ;;  %v677_v9 = vpop.f32.mrf.mxu1 }
 0x108   :  { %1793 = vst [vmem:[#allocation8 + $0x8] sm:$0xff] %v1641_v2   ;;  %1809 = vst [vmem:[#allocation8 + $0x88] sm:$0xff] %v1721_v3   ;;  %v1636_v10 = vpack.c.bf16 %v1062_v4, %v1061_v62  ;;  %v1716_v11 = vpack.c.bf16 %v1094_v5, %v1093_v63  ;;  %v994_v12 = vmul.f32 %v2116_v40, %v549_v8 }
 0x109   :  { %v1026_v13 = vmul.f32 %v2116_v40, %v677_v9  ;;  %v1887_v14 = vpop.f32.mrf.mxu0  ;;  %v1919_v15 = vpop.f32.mrf.mxu1  ;;  %v1067_v18 = vadd.f32 %v2123_v47, %v996_v6  ;;  %v1099_v19 = vadd.f32 %v2123_v47, %v1028_v7 }
 0x10a   :  { %1637 = vst [vmem:[#allocation8] sm:$0xff] %v1636_v10   ;;  %1808 = vst [vmem:[#allocation8 + $0x80] sm:$0xff] %v1716_v11   ;;  %v997_v16 = vmul.f32 %v1887_v14, %v2116_v40  ;;  %v1029_v17 = vmul.f32 %v1919_v15, %v2116_v40  ;;  %v1065_v26 = vadd.f32 %v2123_v47, %v994_v12 }
 0x10b   :  { %v552_v20 = vpop.f32.mrf.mxu0  ;;  %v680_v21 = vpop.f32.mrf.mxu1  ;;  %v1097_v27 = vadd.f32 %v2123_v47, %v1026_v13 }
 0x10c   :  { %v1068_v22 = vadd.f32 %v2123_v47, %v997_v16  ;;  %v1100_v23 = vadd.f32 %v2123_v47, %v1029_v17  ;;  %v995_v24 = vmul.f32 %v2116_v40, %v552_v20  ;;  %v1027_v25 = vmul.f32 %v2116_v40, %v680_v21 }
 0x10d   :  { %v1890_v28 = vpop.f32.mrf.mxu0  ;;  %v1922_v29 = vpop.f32.mrf.mxu1 }
 0x10e   :  { %v1651_v30 = vpack.c.bf16 %v1068_v22, %v1067_v18  ;;  %v1731_v31 = vpack.c.bf16 %v1100_v23, %v1099_v19  ;;  %v1066_v32 = vadd.f32 %v2123_v47, %v995_v24  ;;  %v1098_v33 = vadd.f32 %v2123_v47, %v1027_v25 }
 0x10f   :  { %v1000_v34 = vmul.f32 %v1890_v28, %v2116_v40  ;;  %v1032_v35 = vmul.f32 %v1922_v29, %v2116_v40  ;;  %v565_v36 = vpop.f32.mrf.mxu0  ;;  %v693_v37 = vpop.f32.mrf.mxu1 }
 0x110   :  { %1795 = vst [vmem:[#allocation8 + $0x18] sm:$0xff] %v1651_v30   ;;  %1811 = vst [vmem:[#allocation8 + $0x98] sm:$0xff] %v1731_v31   ;;  %v1646_v38 = vpack.c.bf16 %v1066_v32, %v1065_v26  ;;  %v1726_v39 = vpack.c.bf16 %v1098_v33, %v1097_v27  ;;  %v998_v41 = vmul.f32 %v2116_v40, %v565_v36 }
 0x111   :  { %v1030_v42 = vmul.f32 %v2116_v40, %v693_v37  ;;  %v1891_v43 = vpop.f32.mrf.mxu0  ;;  %v1923_v44 = vpop.f32.mrf.mxu1  ;;  %v1071_v48 = vadd.f32 %v2123_v47, %v1000_v34  ;;  %v1103_v49 = vadd.f32 %v2123_v47, %v1032_v35 }
 0x112   :  { %1794 = vst [vmem:[#allocation8 + $0x10] sm:$0xff] %v1646_v38   ;;  %1810 = vst [vmem:[#allocation8 + $0x90] sm:$0xff] %v1726_v39   ;;  %v1001_v45 = vmul.f32 %v1891_v43, %v2116_v40  ;;  %v1033_v46 = vmul.f32 %v1923_v44, %v2116_v40  ;;  %v1069_v56 = vadd.f32 %v2123_v47, %v998_v41 }
 0x113   :  { %v568_v50 = vpop.f32.mrf.mxu0  ;;  %v696_v51 = vpop.f32.mrf.mxu1  ;;  %v1101_v57 = vadd.f32 %v2123_v47, %v1030_v42 }
 0x114   :  { %v1072_v52 = vadd.f32 %v2123_v47, %v1001_v45  ;;  %v1104_v53 = vadd.f32 %v2123_v47, %v1033_v46  ;;  %v999_v54 = vmul.f32 %v2116_v40, %v568_v50  ;;  %v1031_v55 = vmul.f32 %v2116_v40, %v696_v51 }
 0x115   :  { %v1894_v58 = vpop.f32.mrf.mxu0  ;;  %v1926_v59 = vpop.f32.mrf.mxu1 }
 0x116   :  { %v1661_v60 = vpack.c.bf16 %v1072_v52, %v1071_v48  ;;  %v1741_v61 = vpack.c.bf16 %v1104_v53, %v1103_v49  ;;  %v1070_v62 = vadd.f32 %v2123_v47, %v999_v54  ;;  %v1102_v63 = vadd.f32 %v2123_v47, %v1031_v55 }
 0x117   :  { %v1004_v0 = vmul.f32 %v1894_v58, %v2116_v40  ;;  %v1036_v1 = vmul.f32 %v1926_v59, %v2116_v40  ;;  %v581_v2 = vpop.f32.mrf.mxu0  ;;  %v709_v3 = vpop.f32.mrf.mxu1 }
 0x118   :  { %1797 = vst [vmem:[#allocation8 + $0x28] sm:$0xff] %v1661_v60   ;;  %1813 = vst [vmem:[#allocation8 + $0xa8] sm:$0xff] %v1741_v61   ;;  %v1656_v4 = vpack.c.bf16 %v1070_v62, %v1069_v56  ;;  %v1736_v5 = vpack.c.bf16 %v1102_v63, %v1101_v57  ;;  %v1002_v6 = vmul.f32 %v2116_v40, %v581_v2 }
 0x119   :  { %v1034_v7 = vmul.f32 %v2116_v40, %v709_v3  ;;  %v1895_v8 = vpop.f32.mrf.mxu0  ;;  %v1927_v9 = vpop.f32.mrf.mxu1  ;;  %v1075_v12 = vadd.f32 %v2123_v47, %v1004_v0  ;;  %v1107_v13 = vadd.f32 %v2123_v47, %v1036_v1 }
 0x11a   :  { %1796 = vst [vmem:[#allocation8 + $0x20] sm:$0xff] %v1656_v4   ;;  %1812 = vst [vmem:[#allocation8 + $0xa0] sm:$0xff] %v1736_v5   ;;  %v1005_v10 = vmul.f32 %v1895_v8, %v2116_v40  ;;  %v1037_v11 = vmul.f32 %v1927_v9, %v2116_v40  ;;  %v1073_v20 = vadd.f32 %v2123_v47, %v1002_v6 }
 0x11b   :  { %v584_v14 = vpop.f32.mrf.mxu0  ;;  %v712_v15 = vpop.f32.mrf.mxu1  ;;  %v1105_v21 = vadd.f32 %v2123_v47, %v1034_v7 }
 0x11c   :  { %v1076_v16 = vadd.f32 %v2123_v47, %v1005_v10  ;;  %v1108_v17 = vadd.f32 %v2123_v47, %v1037_v11  ;;  %v1003_v18 = vmul.f32 %v2116_v40, %v584_v14  ;;  %v1035_v19 = vmul.f32 %v2116_v40, %v712_v15 }
 0x11d   :  { %v1898_v22 = vpop.f32.mrf.mxu0  ;;  %v1930_v23 = vpop.f32.mrf.mxu1 }
 0x11e   :  { %v1671_v24 = vpack.c.bf16 %v1076_v16, %v1075_v12  ;;  %v1751_v25 = vpack.c.bf16 %v1108_v17, %v1107_v13  ;;  %v1074_v26 = vadd.f32 %v2123_v47, %v1003_v18  ;;  %v1106_v27 = vadd.f32 %v2123_v47, %v1035_v19 }
 0x11f   :  { %v1008_v28 = vmul.f32 %v1898_v22, %v2116_v40  ;;  %v1040_v29 = vmul.f32 %v1930_v23, %v2116_v40  ;;  %v597_v30 = vpop.f32.mrf.mxu0  ;;  %v725_v31 = vpop.f32.mrf.mxu1 }
 0x120   :  { %1799 = vst [vmem:[#allocation8 + $0x38] sm:$0xff] %v1671_v24   ;;  %1815 = vst [vmem:[#allocation8 + $0xb8] sm:$0xff] %v1751_v25   ;;  %v1666_v32 = vpack.c.bf16 %v1074_v26, %v1073_v20  ;;  %v1746_v33 = vpack.c.bf16 %v1106_v27, %v1105_v21  ;;  %v1006_v34 = vmul.f32 %v2116_v40, %v597_v30 }
 0x121   :  { %v1038_v35 = vmul.f32 %v2116_v40, %v725_v31  ;;  %v1899_v36 = vpop.f32.mrf.mxu0  ;;  %v1931_v37 = vpop.f32.mrf.mxu1  ;;  %v1079_v41 = vadd.f32 %v2123_v47, %v1008_v28  ;;  %v1111_v42 = vadd.f32 %v2123_v47, %v1040_v29 }
 0x122   :  { %1798 = vst [vmem:[#allocation8 + $0x30] sm:$0xff] %v1666_v32   ;;  %1814 = vst [vmem:[#allocation8 + $0xb0] sm:$0xff] %v1746_v33   ;;  %v1009_v38 = vmul.f32 %v1899_v36, %v2116_v40  ;;  %v1041_v39 = vmul.f32 %v1931_v37, %v2116_v40  ;;  %v1077_v50 = vadd.f32 %v2123_v47, %v1006_v34 }
 0x123   :  { %v600_v43 = vpop.f32.mrf.mxu0  ;;  %v728_v44 = vpop.f32.mrf.mxu1  ;;  %v1109_v51 = vadd.f32 %v2123_v47, %v1038_v35 }
 0x124   :  { %v1080_v45 = vadd.f32 %v2123_v47, %v1009_v38  ;;  %v1112_v46 = vadd.f32 %v2123_v47, %v1041_v39  ;;  %v1007_v48 = vmul.f32 %v2116_v40, %v600_v43  ;;  %v1039_v49 = vmul.f32 %v2116_v40, %v728_v44 }
 0x125   :  { %v1902_v52 = vpop.f32.mrf.mxu0  ;;  %v1934_v53 = vpop.f32.mrf.mxu1 }
 0x126   :  { %v1681_v54 = vpack.c.bf16 %v1080_v45, %v1079_v41  ;;  %v1761_v55 = vpack.c.bf16 %v1112_v46, %v1111_v42  ;;  %v1078_v56 = vadd.f32 %v2123_v47, %v1007_v48  ;;  %v1110_v57 = vadd.f32 %v2123_v47, %v1039_v49 }
 0x127   :  { %v1012_v58 = vmul.f32 %v1902_v52, %v2116_v40  ;;  %v1044_v59 = vmul.f32 %v1934_v53, %v2116_v40  ;;  %v613_v60 = vpop.f32.mrf.mxu0  ;;  %v741_v61 = vpop.f32.mrf.mxu1 }
 0x128   :  { %1801 = vst [vmem:[#allocation8 + $0x48] sm:$0xff] %v1681_v54   ;;  %1817 = vst [vmem:[#allocation8 + $0xc8] sm:$0xff] %v1761_v55   ;;  %v1676_v62 = vpack.c.bf16 %v1078_v56, %v1077_v50  ;;  %v1756_v63 = vpack.c.bf16 %v1110_v57, %v1109_v51  ;;  %v1010_v0 = vmul.f32 %v2116_v40, %v613_v60 }
 0x129   :  { %v1042_v1 = vmul.f32 %v2116_v40, %v741_v61  ;;  %v1903_v2 = vpop.f32.mrf.mxu0  ;;  %v1935_v3 = vpop.f32.mrf.mxu1  ;;  %v1083_v6 = vadd.f32 %v2123_v47, %v1012_v58  ;;  %v1115_v7 = vadd.f32 %v2123_v47, %v1044_v59 }
 0x12a   :  { %1800 = vst [vmem:[#allocation8 + $0x40] sm:$0xff] %v1676_v62   ;;  %1816 = vst [vmem:[#allocation8 + $0xc0] sm:$0xff] %v1756_v63   ;;  %v1013_v4 = vmul.f32 %v1903_v2, %v2116_v40  ;;  %v1045_v5 = vmul.f32 %v1935_v3, %v2116_v40  ;;  %v1081_v14 = vadd.f32 %v2123_v47, %v1010_v0 }
 0x12b   :  { %v616_v8 = vpop.f32.mrf.mxu0  ;;  %v744_v9 = vpop.f32.mrf.mxu1  ;;  %v1113_v15 = vadd.f32 %v2123_v47, %v1042_v1 }
 0x12c   :  { %v1084_v10 = vadd.f32 %v2123_v47, %v1013_v4  ;;  %v1116_v11 = vadd.f32 %v2123_v47, %v1045_v5  ;;  %v1011_v12 = vmul.f32 %v2116_v40, %v616_v8  ;;  %v1043_v13 = vmul.f32 %v2116_v40, %v744_v9 }
 0x12d   :  { %v1906_v16 = vpop.f32.mrf.mxu0  ;;  %v1938_v17 = vpop.f32.mrf.mxu1 }
 0x12e   :  { %v1691_v18 = vpack.c.bf16 %v1084_v10, %v1083_v6  ;;  %v1771_v19 = vpack.c.bf16 %v1116_v11, %v1115_v7  ;;  %v1082_v20 = vadd.f32 %v2123_v47, %v1011_v12  ;;  %v1114_v21 = vadd.f32 %v2123_v47, %v1043_v13 }
 0x12f   :  { %v1016_v22 = vmul.f32 %v1906_v16, %v2116_v40  ;;  %v1048_v23 = vmul.f32 %v1938_v17, %v2116_v40  ;;  %v629_v24 = vpop.f32.mrf.mxu0  ;;  %v757_v25 = vpop.f32.mrf.mxu1 }
 0x130   :  { %1803 = vst [vmem:[#allocation8 + $0x58] sm:$0xff] %v1691_v18   ;;  %1819 = vst [vmem:[#allocation8 + $0xd8] sm:$0xff] %v1771_v19   ;;  %v1686_v26 = vpack.c.bf16 %v1082_v20, %v1081_v14  ;;  %v1766_v27 = vpack.c.bf16 %v1114_v21, %v1113_v15  ;;  %v1014_v28 = vmul.f32 %v2116_v40, %v629_v24 }
 0x131   :  { %v1046_v29 = vmul.f32 %v2116_v40, %v757_v25  ;;  %v1907_v30 = vpop.f32.mrf.mxu0  ;;  %v1939_v31 = vpop.f32.mrf.mxu1  ;;  %v1087_v34 = vadd.f32 %v2123_v47, %v1016_v22  ;;  %v1119_v35 = vadd.f32 %v2123_v47, %v1048_v23 }
 0x132   :  { %1802 = vst [vmem:[#allocation8 + $0x50] sm:$0xff] %v1686_v26   ;;  %1818 = vst [vmem:[#allocation8 + $0xd0] sm:$0xff] %v1766_v27   ;;  %v1017_v32 = vmul.f32 %v1907_v30, %v2116_v40  ;;  %v1049_v33 = vmul.f32 %v1939_v31, %v2116_v40  ;;  %v1085_v43 = vadd.f32 %v2123_v47, %v1014_v28 }
 0x133   :  { %v632_v36 = vpop.f32.mrf.mxu0  ;;  %v760_v37 = vpop.f32.mrf.mxu1  ;;  %v1117_v44 = vadd.f32 %v2123_v47, %v1046_v29 }
 0x134   :  { %v1088_v38 = vadd.f32 %v2123_v47, %v1017_v32  ;;  %v1120_v39 = vadd.f32 %v2123_v47, %v1049_v33  ;;  %v1015_v41 = vmul.f32 %v2116_v40, %v632_v36  ;;  %v1047_v42 = vmul.f32 %v2116_v40, %v760_v37 }
 0x135   :  { %v1910_v45 = vpop.f32.mrf.mxu0  ;;  %v1942_v46 = vpop.f32.mrf.mxu1 }
 0x136   :  { %v1701_v48 = vpack.c.bf16 %v1088_v38, %v1087_v34  ;;  %v1781_v49 = vpack.c.bf16 %v1120_v39, %v1119_v35  ;;  %v1086_v50 = vadd.f32 %v2123_v47, %v1015_v41  ;;  %v1118_v51 = vadd.f32 %v2123_v47, %v1047_v42 }
 0x137   :  { %v1020_v52 = vmul.f32 %v1910_v45, %v2116_v40  ;;  %v1052_v53 = vmul.f32 %v1942_v46, %v2116_v40  ;;  %v645_v54 = vpop.f32.mrf.mxu0  ;;  %v773_v55 = vpop.f32.mrf.mxu1 }
 0x138   :  { %1805 = vst [vmem:[#allocation8 + $0x68] sm:$0xff] %v1701_v48   ;;  %1821 = vst [vmem:[#allocation8 + $0xe8] sm:$0xff] %v1781_v49   ;;  %v1696_v56 = vpack.c.bf16 %v1086_v50, %v1085_v43  ;;  %v1776_v57 = vpack.c.bf16 %v1118_v51, %v1117_v44  ;;  %v1018_v58 = vmul.f32 %v2116_v40, %v645_v54 }
 0x139   :  { %v1050_v59 = vmul.f32 %v2116_v40, %v773_v55  ;;  %v1911_v60 = vpop.f32.mrf.mxu0  ;;  %v1943_v61 = vpop.f32.mrf.mxu1  ;;  %v1091_v0 = vadd.f32 %v2123_v47, %v1020_v52  ;;  %v1123_v1 = vadd.f32 %v2123_v47, %v1052_v53 }
 0x13a   :  { %1804 = vst [vmem:[#allocation8 + $0x60] sm:$0xff] %v1696_v56   ;;  %1820 = vst [vmem:[#allocation8 + $0xe0] sm:$0xff] %v1776_v57   ;;  %v1021_v62 = vmul.f32 %v1911_v60, %v2116_v40  ;;  %v1053_v63 = vmul.f32 %v1943_v61, %v2116_v40  ;;  %v1089_v8 = vadd.f32 %v2123_v47, %v1018_v58 }
 0x13b   :  { %v648_v2 = vpop.f32.mrf.mxu0  ;;  %v776_v3 = vpop.f32.mrf.mxu1  ;;  %v1121_v9 = vadd.f32 %v2123_v47, %v1050_v59 }
 0x13c   :  { %v1092_v4 = vadd.f32 %v2123_v47, %v1021_v62  ;;  %v1124_v5 = vadd.f32 %v2123_v47, %v1053_v63  ;;  %v1019_v6 = vmul.f32 %v2116_v40, %v648_v2  ;;  %v1051_v7 = vmul.f32 %v2116_v40, %v776_v3 }
 0x13e   :  { %v1711_v10 = vpack.c.bf16 %v1092_v4, %v1091_v0  ;;  %v1791_v11 = vpack.c.bf16 %v1124_v5, %v1123_v1  ;;  %v1090_v12 = vadd.f32 %v2123_v47, %v1019_v6  ;;  %v1122_v13 = vadd.f32 %v2123_v47, %v1051_v7 }
 0x140   :  { %1807 = vst [vmem:[#allocation8 + $0x78] sm:$0xff] %v1711_v10   ;;  %1823 = vst [vmem:[#allocation8 + $0xf8] sm:$0xff] %v1791_v11   ;;  %v1706_v14 = vpack.c.bf16 %v1090_v12, %v1089_v8  ;;  %v1786_v15 = vpack.c.bf16 %v1122_v13, %v1121_v9 }
 0x142   :  { %1806 = vst [vmem:[#allocation8 + $0x70] sm:$0xff] %v1706_v14   ;;  %1822 = vst [vmem:[#allocation8 + $0xf0] sm:$0xff] %v1786_v15  }
 0x143   :  { %2056 = shalt.err (!%p2053_p0)
}
 0x144   :  { %1456 = dma.vmem_to_hbm [thread:$0]  %s1451_s3, 4096, %s2261_s4, [#allocation5], %s2072_s18, %s2072_s18, %s2073_s19  }
 0x145   :  { %2069 = dma.done.wait [#allocation5], 4096  }
 0x146   :  { %2070 = vsyncadd [#allocation5], 4294963200 }
 0x147   :  { %1460 = vsyncpa [#allocation4], 1 }
 0x148   :  { %1461 = vsyncpa [#allocation7], 1 }
 0x149   :  { %1462 = vsyncpa [#allocation5], 1 }

</bundles_post_ra>
